<compile_context>
chip_gen: v7x
topology: tpu7x:2x2x1
jax: 0.10.0
libtpu: 0.0.40
codegen_flags: <defaults>
</compile_context>

<pallas_src>
import jax
import jax.numpy as jnp
from jax.experimental import pallas as pl
from jax.experimental.pallas import tpu as pltpu


def _round_up(v: int, m: int) -> int:
    return ((v + m - 1) // m) * m


def perceptron_kernel(x_ref, w_ref, b_ref, o_ref):
    # x_ref: (TM, 37) f32 VMEM (last block may be partial; tail rows unspecified)
    # w_ref: (1, 37)  f32 VMEM (constant index_map -> resident across the grid)
    # b_ref: (1,)     f32 SMEM scalar
    # o_ref: (1, TM)  f32 VMEM, lane-dense.  OOB lanes of the last block are
    #                 masked on writeback, so garbage from unspecified x rows
    #                 never reaches HBM.
    y = jax.lax.dot_general(
        w_ref[...], x_ref[...],
        dimension_numbers=(((1,), (1,)), ((), ())),
        preferred_element_type=jnp.float32,
        precision=jax.lax.Precision.HIGHEST,
    )                                                   # (1, TM)
    o_ref[...] = (y + b_ref[0]).astype(o_ref.dtype)     # scalar bias from SMEM


def perceptron_forward(x, weight, bias, *, tm_cap=16384):
    """x: (B, 37) f32, weight: (1, 37) f32 (PyTorch layout), bias: (1,) f32 -> (B, 1) f32."""
    B, in_features = x.shape
    out_features, k = weight.shape
    assert k == in_features and out_features == 1

    # ---- tile selection (no padding of x; rely on partial last blocks) ----
    tm_cap = max(128, (tm_cap // 128) * 128)
    if B <= 128:
        # Single block whose dims equal the full array dims -> (8,128)-legal.
        tm = B
    else:
        # Multiple of 128 (lane-dense out block) and at least 2 grid steps so
        # the "parallel" axis can feed both TensorCores on v7x.
        tm = min(tm_cap, _round_up(pl.cdiv(B, 2), 128))
    num_tiles = pl.cdiv(B, tm)

    # ---- explicit scoped-VMEM budget (lane/sublane-padded, double-buffered) ----
    x_block_bytes = tm * 128 * 4                              # (tm, 37) pads to (tm, 128)
    out_block_bytes = 8 * _round_up(max(tm, 128), 128) * 4    # (1, tm) pads to (8, tm)
    vmem_bytes = 2 * (x_block_bytes + out_block_bytes) + (4 << 20)
    vmem_bytes = min(max(vmem_bytes, 16 << 20), 48 << 20)

    b1 = bias.reshape(out_features)   # (1,) scalar for SMEM

    out = pl.pallas_call(
        perceptron_kernel,
        out_shape=jax.ShapeDtypeStruct((out_features, B), x.dtype),
        grid_spec=pltpu.PrefetchScalarGridSpec(
            num_scalar_prefetch=0,
            grid=(num_tiles,),
            in_specs=[
                pl.BlockSpec((tm, in_features), lambda i: (i, 0)),
                pl.BlockSpec((out_features, in_features), lambda i: (0, 0)),
                pl.BlockSpec(memory_space=pltpu.MemorySpace.SMEM),
            ],
            out_specs=pl.BlockSpec((out_features, tm), lambda i: (0, i)),
        ),
        compiler_params=pltpu.CompilerParams(
            dimension_semantics=("parallel",),
            vmem_limit_bytes=vmem_bytes,
        ),
    )(x, weight, b1)

    # (1, B) -> (B, 1): free, contiguous reshape since out_features == 1.
    return out.reshape(B, out_features)


if __name__ == "__main__":
    key = jax.random.PRNGKey(0)
    k_x, k_w, k_b = jax.random.split(key, 3)

    B, IN, OUT = 8, 37, 1

    # Deterministic init mirroring nn.Linear default: U(-1/sqrt(in), 1/sqrt(in))
    bound = 1.0 / jnp.sqrt(jnp.float32(IN))
    weight = jax.random.uniform(k_w, (OUT, IN), jnp.float32, -bound, bound)
    bias = jax.random.uniform(k_b, (OUT,), jnp.float32, -bound, bound)

    x = jax.random.normal(k_x, (B, IN), jnp.float32)

    y = perceptron_forward(x, weight, bias)
    y = jax.block_until_ready(y)

    # Reference check against plain JAX linear (same full-f32 precision)
    y_ref = jnp.dot(x, weight.T, precision=jax.lax.Precision.HIGHEST) + bias
    assert y.shape == (B, OUT)
    assert jnp.allclose(y, y_ref, atol=1e-5, rtol=1e-5)

    print("KERNEL_OK")
</pallas_src>

<mosaic_0001>
module attributes {stable_mosaic.version = 11 : i64} {
  func.func @perceptron_kernel(%arg0: i32, %arg1: memref<8x37xf32, #tpu.memory_space<vmem>>, %arg2: memref<1x37xf32, #tpu.memory_space<vmem>>, %arg3: memref<1xf32, #tpu.memory_space<smem>>, %arg4: memref<1x8xf32, #tpu.memory_space<vmem>>) attributes {dimension_semantics = [#tpu.dimension_semantics<parallel>], iteration_bounds = array<i64: 1>, scalar_prefetch = 0 : i64, scratch_operands = 0 : i64, tpu.core_type = #tpu.core_type<tc>, window_params = [{transform_indices = @transform_0, window_bounds = array<i64: 8, 37>}, {pipeline_mode = #tpu.pipeline_mode<synchronous>, transform_indices = @transform_1, window_bounds = array<i64: 1, 37>}, {transform_indices = @transform_2, window_bounds = array<i64: 1>}, {transform_indices = @transform_3, window_bounds = array<i64: 1, 8>}]} {
    %c0 = arith.constant 0 : index
    %c0_0 = arith.constant 0 : index
    %0 = vector.load %arg2[%c0, %c0_0] : memref<1x37xf32, #tpu.memory_space<vmem>>, vector<1x37xf32>
    %c0_1 = arith.constant 0 : index
    %c0_2 = arith.constant 0 : index
    %1 = vector.load %arg1[%c0_1, %c0_2] : memref<8x37xf32, #tpu.memory_space<vmem>>, vector<8x37xf32>
    %cst = arith.constant dense<0.000000e+00> : vector<1x8xf32>
    %2 = tpu.matmul %0, %1, %cst {dimension_numbers = #tpu.dot_dimension_numbers<[1], [1], [0], [0], [0, 0, 1, 0], [], []>, precision = #tpu.contract_precision<fp32>} : vector<1x37xf32>, vector<8x37xf32>, vector<1x8xf32> -> vector<1x8xf32>
    %c0_3 = arith.constant 0 : index
    %3 = memref.load %arg3[%c0_3] : memref<1xf32, #tpu.memory_space<smem>>
    %4 = vector.broadcast %3 : f32 to vector<1x8xf32>
    %5 = arith.addf %2, %4 : vector<1x8xf32>
    %c0_4 = arith.constant 0 : index
    %c0_5 = arith.constant 0 : index
    %6 = vector.load %arg4[%c0_4, %c0_5] : memref<1x8xf32, #tpu.memory_space<vmem>>, vector<1x8xf32>
    tpu.vector_store %arg4[%c0_4, %c0_5], %5 {strides = array<i32>} : memref<1x8xf32, #tpu.memory_space<vmem>>, vector<1x8xf32>,
    return
  }
  func.func @transform_0(%arg0: i32) -> (i32, i32) {
    %c0_i32 = arith.constant 0 : i32
    %c0_i32_0 = arith.constant 0 : i32
    return %arg0, %c0_i32 : i32, i32
  }
  func.func @transform_1(%arg0: i32) -> (i32, i32) {
    %c0_i32 = arith.constant 0 : i32
    %c0_i32_0 = arith.constant 0 : i32
    %c0_i32_1 = arith.constant 0 : i32
    return %c0_i32, %c0_i32_0 : i32, i32
  }
  func.func @transform_2(%arg0: i32) -> i32 {
    %c0_i32 = arith.constant 0 : i32
    %c0_i32_0 = arith.constant 0 : i32
    return %c0_i32 : i32
  }
  func.func @transform_3(%arg0: i32) -> (i32, i32) {
    %c0_i32 = arith.constant 0 : i32
    %c0_i32_0 = arith.constant 0 : i32
    return %c0_i32, %arg0 : i32, i32
  }
}

</mosaic_0001>

<bundles_post_ra>
// kernel: tpu_custom_call.1
= control target key start
LH: loop header
LB: loop body
LE: loop exit
PB: predicated region body
PF: predicated region fallthrough
CT: control target
= control target key end

     0   :  { %9 = vsyncpa [#allocation4], 0  ;;  %s666_s0 = inlined_call_operand.hbm [shape: f32[8,37], index: 0, kind: input, shape index: {}]   ;;  %s667_s1 = inlined_call_operand.vmem [shape: f32[1,37], index: 1, kind: input, shape index: {}]   ;;  %s668_s2 = inlined_call_operand.<no memory space> [shape: f32[1], index: 2, kind: input, shape index: {}]   ;;  %s669_s3 = inlined_call_operand.hbm [shape: f32[1,8], index: 3, kind: output, shape index: {}]  }
   0x1   :  { %10 = vsyncpa [#allocation5], 0  ;;  %s606_s12 = smov [#allocation3]   ;;  %s558_s16 = scalar_lea.hbm %s666_s0, 128 }
   0x2   :  { %s17_s13 = sshll.u32 %s606_s12, 4  ;;  %p559_p0 = scmp.ne.s32.totalorder %s666_s0, %s558_s16  ;;  %s18_s13 = int_to_ptr.vmem [resolvable:$true] %s17_s13 }
   0x3   :  { %p562_p1 = scmp.lt.u32.totalorder %s558_s16, %s666_s0 }
   0x5   :  { %p564_p2 = pnand %p562_p1, %p559_p0 }
   0x7   :  { %567 = shalt.err (!%p564_p2)
}
   0x8   :  { %s568_s21 = scalar_lea.vmem %s18_s13, 128  ;;  %p573_p4 = scmp.lt.s32.totalorder %s18_s13, %s18_s13 }
   0x9   :  { %p569_p3 = scmp.ne.s32.totalorder %s18_s13, %s568_s21  ;;  %p574_p5 = scmp.lt.s32.totalorder %s568_s21, %s568_s21 }
   0xb   :  { %p575_p6 = por %p574_p5, %p573_p4 }
   0xd   :  { %p576_p7 = pnand %p575_p6, %p569_p3 }
   0xf   :  { %579 = shalt.err (!%p576_p7)
}
  0x10   :  { %20 = dma.hbm_to_vmem [thread:$0]  %s666_s0, 128, %s18_s13, [#allocation4]  }
  0x11   :  { %602 = dma.done.wait [#allocation4], 128  }
  0x12   :  { %603 = vsyncadd [#allocation4], 4294967168  ;;  %v607_v0 = vmov 0.0   ;;  %vm608_vm0 = vmmov 0   ;;  %vm32_vm1 = vcmask 302080   ;;  %v29_v1 = vld [vmem:[#allocation3] sm:$0xff]  ;;  %v31_v17 = vstv %s668_s2 }
  0x13   :  { %529 = vmatprep.subr.mxu0 %v607_v0  ;;  %514 = vmatprep.subr.mxu1 %v607_v0  ;;  %v28_v2 = vld [vmem:[%s667_s1] sm:$0x1]  ;;  %v37_v3 = vsel %vm32_vm1, %v29_v1, 0  ;;  %s609_s26 = smov [#allocation6]   ;;  %vm485_vm2 = vcmask 57344  }
  0x14   :  { %531 = vmatprep.mubr.msk.f32.mxu0 %vm608_vm0, %v607_v0  ;;  %516 = vmatprep.mubr.msk.f32.mxu1 %vm608_vm0, %v607_v0  ;;  %v34_v4 = vsel %vm32_vm1, %v28_v2, 0  ;;  %v40_v5 = vand.u32 4294901760, %v37_v3  ;;  %s493_s27 = sshll.u32 %s609_s26, 4  ;;  %s494_s27 = int_to_ptr.vmem [resolvable:$true] %s493_s27 }
  0x15   :  { %v105_v6 = vand.u32 4294901760, %v34_v4  ;;  %s580_s28 = scalar_lea.vmem %s494_s27, 16  ;;  %s584_s29 = scalar_lea.vmem %s494_s27, 32 }
  0x16   :  { %v117_v7 = vsub.f32 %v37_v3, %v40_v5  ;;  %530 = vmatpush3.xpose.msra.mxu0 %v40_v5  ;;  %515 = vmatpush3.xpose.msra.mxu1 %v40_v5  ;;  %p581_p8 = scmp.ne.s32.totalorder %s494_s27, %s580_s28  ;;  %p585_p9 = scmp.lt.s32.totalorder %s494_s27, %s494_s27 }
  0x17   :  { %v106_v8 = vsub.f32 %v34_v4, %v105_v6  ;;  %519 = vmatprep.subr.mxu1 %v607_v0  ;;  %534 = vmatprep.subr.mxu0 %v607_v0  ;;  %p586_p10 = scmp.lt.s32.totalorder %s584_s29, %s580_s28 }
  0x18   :  { %v118_v10 = vand.u32 4294901760, %v117_v7 }
  0x19   :  { %v107_v9 = vand.u32 4294901760, %v106_v8  ;;  %p587_p11 = por %p586_p10, %p585_p9 }
  0x1a   :  { %v119_v12 = vsub.f32 %v117_v7, %v118_v10 }
  0x1b   :  { %532 = vmatmul.mubr.f32.vlgmr.msra.gmra.mrb[0].mxu0 %v107_v9  ;;  %v108_v11 = vsub.f32 %v106_v8, %v107_v9  ;;  %p588_p12 = pnand %p587_p11, %p581_p8 }
  0x1c   :  { %535 = vmatpush3.xpose.msra.mxu0 %v118_v10  ;;  %536 = vmatprep.mubr.msk.f32.mxu0 %vm608_vm0, %v607_v0  ;;  %v120_v14 = vand.u32 4294901760, %v119_v12 }
  0x1d   :  { %v109_v13 = vand.u32 4294901760, %v108_v11  ;;  %539 = vmatprep.subr.mxu0 %v607_v0 }
  0x1f   :  { %517 = vmatmul.mubr.f32.vlgmr.msra.gmra.mrb[0].mxu1 %v109_v13 }
  0x20   :  { %520 = vmatpush3.xpose.msra.mxu1 %v120_v14  ;;  %521 = vmatprep.mubr.msk.f32.mxu1 %vm608_vm0, %v607_v0 }
  0x21   :  { %524 = vmatprep.subr.mxu1 %v607_v0 }
  0x23   :  { %537 = vmatmul.mubr.f32.vlgmr.msra.gmra.mrb[0].mxu0 %v105_v6 }
  0x24   :  { %540 = vmatpush3.xpose.msra.mxu0 %v40_v5  ;;  %541 = vmatprep.mubr.msk.f32.mxu0 %vm608_vm0, %v607_v0 }
  0x27   :  { %522 = vmatmul.mubr.f32.vlgmr.msra.gmra.mrb[0].mxu1 %v105_v6 }
  0x28   :  { %525 = vmatpush3.xpose.msra.mxu1 %v117_v7  ;;  %526 = vmatprep.mubr.msk.f32.mxu1 %vm608_vm0, %v607_v0 }
  0x2b   :  { %542 = vmatmul.mubr.f32.vlgmr.msra.gmra.mrb[0].mxu0 %v105_v6 }
  0x2f   :  { %527 = vmatmul.mubr.f32.vlgmr.msra.gmra.mrb[0].mxu1 %v106_v8 }
  0xfe   :  { %v481_v15 = vpop.f32.mrb[0].mxu0 }
  0xff   :  { %v543_v16 = vpop.f32.mrb[1].mxu0 }
 0x102   :  { %v261_v18 = vpop.f32.mrb[0].mxu1 }
 0x103   :  { %v544_v19 = vadd.f32 %v261_v18, %v31_v17  ;;  %v528_v20 = vpop.f32.mrb[1].mxu1 }
 0x105   :  { %v545_v21 = vadd.f32 %v544_v19, %v481_v15 }
 0x107   :  { %486 = vst.msk [vmem:[#allocation6] sm:$0x1] %vm485_vm2, %v545_v21 }
 0x108   :  { %591 = shalt.err (!%p588_p12)
}
 0x109   :  { %s592_s2 = scalar_lea.hbm %s669_s3, 16 }
 0x10a   :  { %p593_p13 = scmp.ne.s32.totalorder %s669_s3, %s592_s2  ;;  %p596_p0 = scmp.lt.u32.totalorder %s592_s2, %s669_s3 }
 0x10c   :  { %p598_p1 = pnand %p596_p0, %p593_p13 }
 0x10e   :  { %601 = shalt.err (!%p598_p1)
}
 0x10f   :  { %496 = dma.vmem_to_hbm [thread:$0]  %s494_s27, 16, %s669_s3, [#allocation5]  }
 0x110   :  { %604 = dma.done.wait [#allocation5], 16  }
 0x111   :  { %605 = vsyncadd [#allocation5], 4294967280 }
 0x112   :  { %500 = vsyncpa [#allocation4], 1 }
 0x113   :  { %501 = vsyncpa [#allocation5], 1 }

</bundles_post_ra>
